<compile_context>
chip_gen: v7x
topology: tpu7x:2x2x1
jax: 0.10.0
libtpu: 0.0.40
codegen_flags: <defaults>
</compile_context>

<pallas_src>
import functools

import jax
import jax.numpy as jnp
from jax import lax
from jax.experimental import pallas as pl
from jax.experimental.pallas import tpu as pltpu

NEG_INF = -1e30  # large finite negative: robust (no exp(-inf - -inf) NaN) and underflows to 0


# --------------------------------------------------------------------------------------
# Pass 1: K / V projections (plain tiled matmul, computed once per token)
# --------------------------------------------------------------------------------------
def _kv_proj_kernel(x_ref, wkT_ref, wvT_ref, k_ref, v_ref):
    x = x_ref[...]                                                        # (ts, E_p), x.dtype
    k_ref[...] = jnp.dot(x, wkT_ref[...],
                         preferred_element_type=jnp.float32).astype(k_ref.dtype)
    v_ref[...] = jnp.dot(x, wvT_ref[...],
                         preferred_element_type=jnp.float32).astype(v_ref.dtype)


# --------------------------------------------------------------------------------------
# Pass 2: flash attention (Q projection fused at kv==0, output projection fused at finalize)
# --------------------------------------------------------------------------------------
def _flash_attn_kernel(xq_ref, wqT_ref, k_ref, v_ref, woT_ref, o_ref,
                       q_scr, m_scr, l_scr, acc_scr, *, scale, tq, tkv, causal):
    qi = pl.program_id(1)
    kvi = pl.program_id(2)
    n_kv = pl.num_programs(2)

    # ---- per-(batch, q-tile) init: project q once (scale folded in), reset softmax state
    @pl.when(kvi == 0)
    def _():
        xq = xq_ref[...]                                                  # (tq, E_p)
        q = jnp.dot(xq, wqT_ref[...], preferred_element_type=jnp.float32)
        q_scr[...] = (q * scale).astype(q_scr.dtype)
        m_scr[...] = jnp.full_like(m_scr, NEG_INF)
        l_scr[...] = jnp.zeros_like(l_scr)
        acc_scr[...] = jnp.zeros_like(acc_scr)

    # ---- one kv tile of the online softmax
    def compute_block():
        k = k_ref[...]                                                    # (tkv, dk_p)
        v = v_ref[...]                                                    # (tkv, dv_p)

        # q . k^T without materializing a transpose: contract the last dims of both.
        s = lax.dot_general(q_scr[...], k, (((1,), (1,)), ((), ())),
                            preferred_element_type=jnp.float32)           # (tq, tkv) f32

        if causal:
            rows = qi * tq + lax.broadcasted_iota(jnp.int32, (tq, tkv), 0)
            cols = kvi * tkv + lax.broadcasted_iota(jnp.int32, (tq, tkv), 1)
            s = jnp.where(cols > rows, NEG_INF, s)

        m_prev = m_scr[...]
        m_new = jnp.maximum(m_prev, jnp.max(s, axis=-1, keepdims=True))
        alpha = jnp.exp(m_prev - m_new)
        p = jnp.exp(s - m_new)
        l_scr[...] = alpha * l_scr[...] + jnp.sum(p, axis=-1, keepdims=True)
        acc_scr[...] = alpha * acc_scr[...] + jnp.dot(
            p.astype(v.dtype), v, preferred_element_type=jnp.float32)
        m_scr[...] = m_new

    if causal:
        # Skip kv tiles that lie entirely above the diagonal for this q tile.
        pl.when(kvi * tkv <= qi * tq + (tq - 1))(compute_block)
    else:
        compute_block()

    # ---- finalize: normalize (EUP reciprocal) and apply the output projection
    @pl.when(kvi == n_kv - 1)
    def _():
        av = acc_scr[...] * pl.reciprocal(l_scr[...], approx=True)        # (tq, dv_p) f32
        out = jnp.dot(av.astype(o_ref.dtype), woT_ref[...],
                      preferred_element_type=jnp.float32)
        o_ref[...] = out.astype(o_ref.dtype)


# --------------------------------------------------------------------------------------
# Wrapper
# --------------------------------------------------------------------------------------
def _round_up(n: int, m: int) -> int:
    return ((n + m - 1) // m) * m


def self_attention(x, wq, wk, wv, wo, causal=True, block_q=128, block_kv=128):
    """Matches SelfAttention.forward (return_scores=False).

    x:  (B, S, E)
    wq/wk: (dim_k, E), wv: (dim_v, E), wo: (dim_v, dim_v)   [nn.Linear (out, in) layout]
    """
    B, S, E = x.shape
    dim_k, dim_v = wq.shape[0], wv.shape[0]
    scale = float(dim_k) ** (-0.5)          # scale uses the *unpadded* dim_k

    tq = min(block_q, S)
    tkv = min(block_kv, S)
    assert S % tq == 0 and S % tkv == 0, "seq_len must be divisible by the tile sizes"

    # Zero-pad lane dims to multiples of 128: semantics-preserving (zero rows/cols contribute
    # nothing) and yields dense (8,128) tiles, full MXU lanes and unmasked stores.
    E_p, dk_p, dv_p = (_round_up(d, 128) for d in (E, dim_k, dim_v))
    xp = x if E_p == E else jnp.pad(x, ((0, 0), (0, 0), (0, E_p - E)))

    def pad_t(w, out_p, in_p):
        # (out, in) -> zero-pad -> transpose to (in_p, out_p) so the kernels never transpose.
        o, i = w.shape
        wp = w if (o == out_p and i == in_p) else jnp.pad(w, ((0, out_p - o), (0, in_p - i)))
        return wp.T

    wqT = pad_t(wq, dk_p, E_p)      # (E_p, dk_p)
    wkT = pad_t(wk, dk_p, E_p)      # (E_p, dk_p)
    wvT = pad_t(wv, dv_p, E_p)      # (E_p, dv_p)
    woT = pad_t(wo, dv_p, dv_p)     # (dv_p, dv_p)

    bytes_per = jnp.dtype(x.dtype).itemsize

    # ---------------- Pass 1: K / V projections (once per token) ----------------
    ts = tkv
    kv_cost = pl.CostEstimate(
        flops=2 * B * S * E * (dim_k + dim_v),
        transcendentals=0,
        bytes_accessed=(B * S * E_p + B * S * (dk_p + dv_p)
                        + E_p * (dk_p + dv_p)) * bytes_per,
    )
    k_proj, v_proj = pl.pallas_call(
        _kv_proj_kernel,
        out_shape=(jax.ShapeDtypeStruct((B, S, dk_p), x.dtype),
                   jax.ShapeDtypeStruct((B, S, dv_p), x.dtype)),
        grid_spec=pltpu.PrefetchScalarGridSpec(
            num_scalar_prefetch=0,
            grid=(B, S // ts),
            in_specs=[
                pl.BlockSpec((pl.Squeezed(), ts, E_p), lambda b, si: (b, si, 0)),
                pl.BlockSpec((E_p, dk_p), lambda b, si: (0, 0)),
                pl.BlockSpec((E_p, dv_p), lambda b, si: (0, 0)),
            ],
            out_specs=[
                pl.BlockSpec((pl.Squeezed(), ts, dk_p), lambda b, si: (b, si, 0)),
                pl.BlockSpec((pl.Squeezed(), ts, dv_p), lambda b, si: (b, si, 0)),
            ],
        ),
        compiler_params=pltpu.CompilerParams(
            dimension_semantics=("parallel", "parallel")),
        cost_estimate=kv_cost,
    )(xp, wkT, wvT)

    # ---------------- Pass 2: flash attention + fused Q / output projections ----------------
    attn_flops = (2 * B * S * E * dim_k                       # fused Q projection
                  + 2 * B * S * S * (dim_k + dim_v)           # scores + weighted sum
                  + 2 * B * S * dim_v * dim_v)                # fused output projection
    attn_cost = pl.CostEstimate(
        flops=attn_flops // 2 if causal else attn_flops,
        transcendentals=B * S * S,
        bytes_accessed=(B * S * E_p + B * S * (dk_p + dv_p) + B * S * dv_p
                        + E_p * dk_p + dv_p * dv_p) * bytes_per,
    )
    kernel = functools.partial(_flash_attn_kernel, scale=scale, tq=tq, tkv=tkv, causal=causal)

    out_p = pl.pallas_call(
        kernel,
        out_shape=jax.ShapeDtypeStruct((B, S, dv_p), x.dtype),
        grid_spec=pltpu.PrefetchScalarGridSpec(
            num_scalar_prefetch=0,
            grid=(B, S // tq, S // tkv),
            in_specs=[
                # x viewed as the current q tile (constant over the kv axis)
                pl.BlockSpec((pl.Squeezed(), tq, E_p), lambda b, qi, kvi: (b, qi, 0)),
                # pre-transposed Wq (constant block)
                pl.BlockSpec((E_p, dk_p), lambda b, qi, kvi: (0, 0)),
                # precomputed K / V tiles
                pl.BlockSpec((pl.Squeezed(), tkv, dk_p), lambda b, qi, kvi: (b, kvi, 0)),
                pl.BlockSpec((pl.Squeezed(), tkv, dv_p), lambda b, qi, kvi: (b, kvi, 0)),
                # pre-transposed Wo (constant block)
                pl.BlockSpec((dv_p, dv_p), lambda b, qi, kvi: (0, 0)),
            ],
            out_specs=pl.BlockSpec((pl.Squeezed(), tq, dv_p), lambda b, qi, kvi: (b, qi, 0)),
            scratch_shapes=[
                pltpu.VMEM((tq, dk_p), x.dtype),      # scaled q tile (projected once per q tile)
                pltpu.VMEM((tq, 1), jnp.float32),     # running max m
                pltpu.VMEM((tq, 1), jnp.float32),     # running denominator l
                pltpu.VMEM((tq, dv_p), jnp.float32),  # un-normalized output accumulator
            ],
        ),
        compiler_params=pltpu.CompilerParams(
            dimension_semantics=("parallel", "parallel", "arbitrary")),
        cost_estimate=attn_cost,
    )(xp, wqT, k_proj, v_proj, woT)

    return out_p[..., :dim_v] if dv_p != dim_v else out_p


def _reference(x, wq, wk, wv, wo, causal=True):
    # plain-JAX reproduction of the PyTorch forward, for verification
    q = x @ wq.T
    k = x @ wk.T
    v = x @ wv.T
    scores = jnp.einsum("bqd,bkd->bqk", q, k)
    if causal:
        S = x.shape[1]
        mask = jnp.triu(jnp.ones((S, S), dtype=bool), k=1)
        scores = jnp.where(mask[None, ...], -jnp.inf, scores)
    p = jax.nn.softmax(scores * (wq.shape[0] ** -0.5), axis=-1)
    return (p @ v) @ wo.T


if __name__ == "__main__":
    B, S, E = 2, 8, 32
    dim_k = dim_v = E

    key = jax.random.PRNGKey(0)
    kx, kq, kk, kv_key, ko = jax.random.split(key, 5)

    x = jax.random.normal(kx, (B, S, E), dtype=jnp.float32)
    # nn.Linear weights are (out_features, in_features); deterministic init
    wq = jax.random.normal(kq, (dim_k, E), dtype=jnp.float32) * 0.1
    wk = jax.random.normal(kk, (dim_k, E), dtype=jnp.float32) * 0.1
    wv = jax.random.normal(kv_key, (dim_v, E), dtype=jnp.float32) * 0.1
    wo = jax.random.normal(ko, (dim_v, dim_v), dtype=jnp.float32) * 0.1

    out = self_attention(x, wq, wk, wv, wo, causal=True)
    out = jax.block_until_ready(out)

    ref = _reference(x, wq, wk, wv, wo, causal=True)
    assert out.shape == (B, S, dim_v), out.shape
    # tolerance accounts for the EUP approx reciprocal in the softmax normalize
    assert jnp.allclose(out, ref, atol=2e-3, rtol=2e-3), "mismatch vs reference"

    print("KERNEL_OK")
</pallas_src>

<mosaic_0001>
module attributes {stable_mosaic.version = 11 : i64} {
  func.func @_kv_proj_kernel(%arg0: i32, %arg1: i32, %arg2: memref<1x8x128xf32, #tpu.memory_space<vmem>>, %arg3: memref<128x128xf32, #tpu.memory_space<vmem>>, %arg4: memref<128x128xf32, #tpu.memory_space<vmem>>, %arg5: memref<1x8x128xf32, #tpu.memory_space<vmem>>, %arg6: memref<1x8x128xf32, #tpu.memory_space<vmem>>) attributes {dimension_semantics = [#tpu.dimension_semantics<parallel>, #tpu.dimension_semantics<parallel>], iteration_bounds = array<i64: 2, 1>, scalar_prefetch = 0 : i64, scratch_operands = 0 : i64, tpu.core_type = #tpu.core_type<tc>, window_params = [{transform_indices = @transform_0, window_bounds = array<i64: 1, 8, 128>}, {pipeline_mode = #tpu.pipeline_mode<synchronous>, transform_indices = @transform_1, window_bounds = array<i64: 128, 128>}, {pipeline_mode = #tpu.pipeline_mode<synchronous>, transform_indices = @transform_2, window_bounds = array<i64: 128, 128>}, {transform_indices = @transform_3, window_bounds = array<i64: 1, 8, 128>}, {transform_indices = @transform_4, window_bounds = array<i64: 1, 8, 128>}]} {
    %c0 = arith.constant 0 : index
    %c0_0 = arith.constant 0 : index
    %c0_1 = arith.constant 0 : index
    %0 = vector.load %arg2[%c0, %c0_0, %c0_1] : memref<1x8x128xf32, #tpu.memory_space<vmem>>, vector<1x8x128xf32>
    %1 = vector.shape_cast %0 : vector<1x8x128xf32> to vector<8x128xf32>
    %c0_2 = arith.constant 0 : index
    %c0_3 = arith.constant 0 : index
    %2 = vector.load %arg3[%c0_2, %c0_3] : memref<128x128xf32, #tpu.memory_space<vmem>>, vector<128x128xf32>
    %cst = arith.constant dense<0.000000e+00> : vector<8x128xf32>
    %3 = tpu.matmul %1, %2, %cst {dimension_numbers = #tpu.dot_dimension_numbers<[1], [0], [0], [1], [0, 0, 1, 1], [], []>} : vector<8x128xf32>, vector<128x128xf32>, vector<8x128xf32> -> vector<8x128xf32>
    %c0_4 = arith.constant 0 : index
    %c0_5 = arith.constant 0 : index
    %c0_6 = arith.constant 0 : index
    %4 = vector.load %arg5[%c0_4, %c0_5, %c0_6] : memref<1x8x128xf32, #tpu.memory_space<vmem>>, vector<1x8x128xf32>
    %5 = vector.shape_cast %4 : vector<1x8x128xf32> to vector<8x128xf32>
    %6 = vector.shape_cast %3 : vector<8x128xf32> to vector<1x8x128xf32>
    tpu.vector_store %arg5[%c0_4, %c0_5, %c0_6], %6 {strides = array<i32>} : memref<1x8x128xf32, #tpu.memory_space<vmem>>, vector<1x8x128xf32>,
    %c0_7 = arith.constant 0 : index
    %c0_8 = arith.constant 0 : index
    %7 = vector.load %arg4[%c0_7, %c0_8] : memref<128x128xf32, #tpu.memory_space<vmem>>, vector<128x128xf32>
    %cst_9 = arith.constant dense<0.000000e+00> : vector<8x128xf32>
    %8 = tpu.matmul %1, %7, %cst_9 {dimension_numbers = #tpu.dot_dimension_numbers<[1], [0], [0], [1], [0, 0, 1, 1], [], []>} : vector<8x128xf32>, vector<128x128xf32>, vector<8x128xf32> -> vector<8x128xf32>
    %c0_10 = arith.constant 0 : index
    %c0_11 = arith.constant 0 : index
    %c0_12 = arith.constant 0 : index
    %9 = vector.load %arg6[%c0_10, %c0_11, %c0_12] : memref<1x8x128xf32, #tpu.memory_space<vmem>>, vector<1x8x128xf32>
    %10 = vector.shape_cast %9 : vector<1x8x128xf32> to vector<8x128xf32>
    %11 = vector.shape_cast %8 : vector<8x128xf32> to vector<1x8x128xf32>
    tpu.vector_store %arg6[%c0_10, %c0_11, %c0_12], %11 {strides = array<i32>} : memref<1x8x128xf32, #tpu.memory_space<vmem>>, vector<1x8x128xf32>,
    return
  }
  func.func @transform_0(%arg0: i32, %arg1: i32) -> (i32, i32, i32) {
    %c0_i32 = arith.constant 0 : i32
    %c0_i32_0 = arith.constant 0 : i32
    return %arg0, %arg1, %c0_i32 : i32, i32, i32
  }
  func.func @transform_1(%arg0: i32, %arg1: i32) -> (i32, i32) {
    %c0_i32 = arith.constant 0 : i32
    %c0_i32_0 = arith.constant 0 : i32
    %c0_i32_1 = arith.constant 0 : i32
    return %c0_i32, %c0_i32_0 : i32, i32
  }
  func.func @transform_2(%arg0: i32, %arg1: i32) -> (i32, i32) {
    %c0_i32 = arith.constant 0 : i32
    %c0_i32_0 = arith.constant 0 : i32
    %c0_i32_1 = arith.constant 0 : i32
    return %c0_i32, %c0_i32_0 : i32, i32
  }
  func.func @transform_3(%arg0: i32, %arg1: i32) -> (i32, i32, i32) {
    %c0_i32 = arith.constant 0 : i32
    %c0_i32_0 = arith.constant 0 : i32
    return %arg0, %arg1, %c0_i32 : i32, i32, i32
  }
  func.func @transform_4(%arg0: i32, %arg1: i32) -> (i32, i32, i32) {
    %c0_i32 = arith.constant 0 : i32
    %c0_i32_0 = arith.constant 0 : i32
    return %arg0, %arg1, %c0_i32 : i32, i32, i32
  }
}

</mosaic_0001>

<bundles_post_ra>
// kernel: tpu_custom_call.1
= control target key start
LH: loop header
LB: loop body
LE: loop exit
PB: predicated region body
PF: predicated region fallthrough
CT: control target
= control target key end

     0   :  { %10 = vsyncpa [#allocation3], 0  ;;  %s1421_s0 = inlined_call_operand.hbm [shape: f32[2,8,128], index: 0, kind: input, shape index: {}]   ;;  %s1422_s1 = inlined_call_operand.hbm [shape: f32[128,128], index: 1, kind: input, shape index: {}]   ;;  %s1423_s2 = inlined_call_operand.hbm [shape: f32[128,128], index: 2, kind: input, shape index: {}]   ;;  %s1424_s3 = inlined_call_operand.hbm [shape: f32[2,8,128], index: 3, kind: output, shape index: {0}]   ;;  %s1425_s4 = inlined_call_operand.hbm [shape: f32[2,8,128], index: 4, kind: output, shape index: {1}]  }
   0x1   :  { %12 = vsyncpa [#allocation3 + $0x1], 0 }
   0x2   :  { %13 = vsyncpa [#allocation6], 0 }
   0x3   :  { %14 = vsyncpa [#allocation4], 0 }
   0x4   :  { %16 = vsyncpa [#allocation4 + $0x1], 0 }
   0x5   :  { %17 = vsyncpa [#allocation10], 0 }
   0x6   :  { %19 = vsyncpa [#allocation10 + $0x1], 0  ;;  %s1119_s15 = smov 0   ;;  %s1121_s16 = smov 0  }
   0x7   :  { %s1123_s17 = smov 0   ;;  %s1125_s18 = smov 0  }
   0x8   :  { %s1127_s19 = smov 0   ;;  %s1129_s20 = smov 0  }
   0x9 LB: > { %s613_s21 = sadd.s32 4294967295, %s1082_s20   ;;  %s614_s22 = sadd.s32 4294967294, %s1082_s20   ;;  %s1082_s20 = sphi %s1129_s20, %s25_s20   ;;  %s1078_s19 = sphi %s1127_s19, %s1447_s19   ;;  %s1074_s18 = sphi %s1125_s18, %s1446_s18   ;;  %s1070_s17 = sphi %s1123_s17, %s1445_s17   ;;  %s1066_s16 = sphi %s1121_s16, %s1444_s16   ;;  %s1062_s15 = sphi %s1119_s15, %s1443_s15  }
   0xa   : > { %p59_p0 = scmp.ne.s32.totalorder %s1066_s16, %s1062_s15  ;;  %p1153_p1 = scmp.eq.s32.totalorder %s613_s21, 0 }
   0xb   : > { %p1157_p2 = scmp.eq.s32.totalorder %s613_s21, 1  ;;  %p133_p3 = scmp.eq.s32.totalorder %s614_s22, 1 }
   0xc   : > { %s1430_s23 = scalar_select %p1153_p1, 1, 0 }
   0xd   : > { %p1163_p4 = por %p1153_p1, %p59_p0  ;;  %p615_p5 = scmp.ge.s32.totalorder %s1082_s20, 1 }
   0xe   : > { %p1168_p6 = por %p133_p3, %p59_p0  ;;  %p168_p7 = scmp.lt.s32.totalorder %s1082_s20, 3 }
   0xf   : > { %s1432_s25 = scalar_select %p1163_p4, 1, 0 }
  0x10   : > { %s1433_s26 = scalar_select %p1168_p6, 1, 0 }
  0x11   : > { %p1173_p8 = pnand %p615_p5, %p168_p7  ;;  %s1084_s28 = smov [#allocation5]  }
  0x12   : > { %s180_s29 = sshll.u32 %s1084_s28, 4  ;;  %s1085_s5 = smov [#allocation7]   ;;  %s1177_s29 = int_to_ptr.vmem [resolvable:$true] %s180_s29 }
  0x13   : > { %p799_p9 = pneg %p1173_p8  ;;  %s193_s6 = sshll.u32 %s1085_s5, 4  ;;  %s1188_s6 = int_to_ptr.vmem [resolvable:$true] %s193_s6 }
  0x14   : > { %s878_s9 = scalar_lea.hbm %s1422_s1, 2048 }
  0x15   : > { %p1184_p11 = pnand %p799_p9, %p1153_p1  ;;  %p879_p12 = scmp.ne.s32.totalorder %s1422_s1, %s878_s9 }
  0x16   : > { %p885_p5 = scmp.lt.u32.totalorder %s878_s9, %s1422_s1 }
  0x17   : > { %p880_p13 = pneg %p1184_p11 }
  0x19   : > { %p881_p0 = pnand %p880_p13, %p879_p12 }
  0x1b   : > { %p882_p3 = pneg %p881_p0 }
  0x1d   : > { %p887_p7 = pnand %p885_p5, %p882_p3 }
  0x1f   : > { %890 = shalt.err (!%p887_p7)
}
  0x20   : > { %s891_s14 = scalar_lea.vmem %s1177_s29, 2048  ;;  %p899_p1 = scmp.lt.s32.totalorder %s1177_s29, %s1177_s29 }
  0x21   : > { %p892_p9 = scmp.ne.s32.totalorder %s1177_s29, %s891_s14  ;;  %p900_p12 = scmp.lt.s32.totalorder %s891_s14, %s891_s14 }
  0x23   : > { %p894_p10 = pnand %p892_p9, %p880_p13  ;;  %p901_p0 = por %p900_p12, %p899_p1 }
  0x25   : > { %p895_p6 = pneg %p894_p10 }
  0x27   : > { %p902_p4 = pnand %p901_p0, %p895_p6 }
  0x29   : > { %905 = shalt.err (!%p902_p4)
}
  0x2a   : > { %s1086_s21 = smov 128   ;;  %s1087_s22 = smov 8  }
  0x2b   : > { %802 = dma.hbm_to_vmem [thread:$0]  (!%p1184_p11), %s1422_s1, 2048, %s1177_s29, [#allocation6], %s1086_s21, %s1086_s21, %s1087_s22  }
  0x2c   : > { %s906_s9 = scalar_lea.hbm %s1423_s2, 2048 }
  0x2d   : > { %p907_p1 = scmp.ne.s32.totalorder %s1423_s2, %s906_s9  ;;  %p913_p10 = scmp.lt.u32.totalorder %s906_s9, %s1423_s2 }
  0x2f   : > { %p909_p4 = pnand %p907_p1, %p880_p13 }
  0x31   : > { %p910_p6 = pneg %p909_p4 }
  0x33   : > { %p915_p3 = pnand %p913_p10, %p910_p6 }
  0x35   : > { %918 = shalt.err (!%p915_p3)
}
  0x36   : > { %s919_s29 = scalar_lea.vmem %s1188_s6, 2048  ;;  %p927_p12 = scmp.lt.s32.totalorder %s1188_s6, %s1188_s6 }
  0x37   : > { %p920_p5 = scmp.ne.s32.totalorder %s1188_s6, %s919_s29  ;;  %p928_p0 = scmp.lt.s32.totalorder %s919_s29, %s919_s29 }
  0x39   : > { %p922_p7 = pnand %p920_p5, %p880_p13  ;;  %p929_p1 = por %p928_p0, %p927_p12 }
  0x3b   : > { %p923_p9 = pneg %p922_p7 }
  0x3d   : > { %p930_p4 = pnand %p929_p1, %p923_p9 }
  0x3f   : > { %933 = shalt.err (!%p930_p4)
}
  0x40   : > { %805 = dma.hbm_to_vmem [thread:$0]  (!%p1184_p11), %s1423_s2, 2048, %s1188_s6, [#allocation6], %s1086_s21, %s1086_s21, %s1087_s22  }
  0x41   : > { %s37_s5 = sadd.s32 1, %s1078_s19  ;;  %s46_s7 = sadd.s32 1, %s1070_s17 }
  0x42   : > { %p39_p13 = scmp.ge.s32.totalorder %s37_s5, 2  ;;  %p53_p6 = scmp.ne.s32.totalorder %s1070_s17, %s1066_s16 }
  0x43   : > { %p54_p10 = scmp.eq.s32.totalorder %s1082_s20, 0  ;;  %p819_p3 = scmp.lt.s32.totalorder %s1082_s20, 2 }
  0x44   : > { %s1449_s5 = smov (%p39_p13, %s37_s5), 0  ;;  %p1252_p7 = por %p1157_p2, %p53_p6 }
  0x45   : > { %p55_p5 = por %p54_p10, %p53_p6  ;;  %s41_s8 = ssub.s32 %s1078_s19, %s1449_s5 }
  0x46   : > { %s1436_s30 = scalar_select %p1252_p7, 1, 0 }
  0x47   : > { %s207_s9 = sand.u32 1, %s1070_s17   ;;  %p44_p9 = scmp.eq.s32.totalorder %s41_s8, 0 }
  0x48   : > { %s619_s6 = sshll.u32 %s207_s9, 3  ;;  %s620_s21 = sshll.u32 %s1078_s19, 7 }
  0x49   : > { %s1261_s22 = scalar_select %p44_p9, %s1070_s17, %s46_s7  }
  0x4a   : > { %s1266_s12 = scalar_lea.hbm %s1421_s0, %s620_s21  ;;  %s211_s24 = scalar_lea.vmem [#allocation2], %s619_s6 }
  0x4b   : > { %s219_s13 = sshll.u32 %s211_s24, 4  ;;  %p1270_p2 = pnand %p819_p3, %p55_p5  ;;  %s1274_s13 = int_to_ptr.vmem [resolvable:$true] %s219_s13 }
  0x4c   : > { %s208_s14 = scalar_lea.sflag [#allocation3], %s207_s9  ;;  %s934_s28 = scalar_lea.hbm %s1266_s12, 128 }
  0x4d   : > { %p935_p11 = scmp.ne.s32.totalorder %s1266_s12, %s934_s28  ;;  %p936_p12 = pneg %p1270_p2 }
  0x4e   : > { %s939_s6 = scalar_lea.hbm %s1421_s0, 256  ;;  %p940_p4 = scmp.lt.u32.totalorder %s1266_s12, %s1421_s0 }
  0x4f   : > { %p937_p0 = pnand %p936_p12, %p935_p11  ;;  %p941_p13 = scmp.lt.u32.totalorder %s939_s6, %s934_s28 }
  0x50   : > { %p943_p10 = scmp.lt.u32.totalorder %s934_s28, %s1266_s12 }
  0x51   : > { %p938_p1 = pneg %p937_p0  ;;  %p942_p6 = por %p941_p13, %p940_p4 }
  0x53   : > { %p944_p3 = por %p943_p10, %p942_p6 }
  0x55   : > { %p945_p5 = pnand %p944_p3, %p938_p1 }
  0x57   : > { %948 = shalt.err (!%p945_p5)
}
  0x58   : > { %s949_s9 = scalar_lea.vmem %s1274_s13, 128  ;;  %s1088_s11 = smov [#allocation2]  }
  0x59   : > { %p950_p9 = scmp.ne.s32.totalorder %s1274_s13, %s949_s9  ;;  %s954_s24 = sshll.u32 %s1088_s11, 4  ;;  %s955_s24 = int_to_ptr.vmem [resolvable:$false] %s954_s24 }
  0x5a   : > { %s956_s7 = scalar_lea.vmem %s955_s24, 256  ;;  %p957_p7 = scmp.lt.s32.totalorder %s1274_s13, %s955_s24 }
  0x5b   : > { %p952_p11 = pnand %p950_p9, %p936_p12  ;;  %p958_p4 = scmp.lt.s32.totalorder %s956_s7, %s949_s9 }
  0x5d   : > { %p953_p0 = pneg %p952_p11  ;;  %p959_p13 = por %p958_p4, %p957_p7 }
  0x5f   : > { %p960_p6 = pnand %p959_p13, %p953_p0 }
  0x61   : > { %963 = shalt.err (!%p960_p6)
}
  0x62   : > { %809 = dma.hbm_to_vmem [thread:$0]  (!%p1270_p2), %s1266_s12, 128, %s1274_s13, %s208_s14  }
  0x63   : > { %228 = sbr.rel (%p1173_p8) target bundleno = 395 (0x18b), region = 32  ;;  %s1304_s28 = sand.u32 (!%p1173_p8), 1, %s1066_s16  }
  0x64   : > { %s1307_s8 = sshll.u32 (!%p1173_p8), %s1304_s28, 3  ;;  %s231_s6 = scalar_lea.sflag (!%p1173_p8), [#allocation3], %s1304_s28 }
  0x65   : > { %s234_s21 = scalar_lea.vmem (!%p1173_p8), [#allocation2], %s1307_s8  ;;  %p1438_p7 = scmp.ne.s32.totalorder (!%p1173_p8), %s1432_s25, 0 }
  0x6a   : > { %1045 = dma.done.wait (%p1438_p7), %s231_s6, 128  }
  0x6b   : > { %1047 = vsyncadd (%p1438_p7), %s231_s6, 4294967168  ;;  %p1439_p2 = scmp.ne.s32.totalorder %s1430_s23, 0 }
  0x6d   : > { %1049 = dma.done.wait (%p1439_p2), [#allocation6], 4096  }
  0x6e   : > { %1051 = vsyncadd (%p1439_p2), [#allocation6], 4294963200  ;;  %v1089_v0 = vmov 0.0|0.0   ;;  %vm1090_vm0 = vmmov 0   ;;  %v1091_v1 = vmov 0.0   ;;  %v273_v2 = vld [vmem:[#allocation5] sm:$0xff] }
  0x6f   : > { %737 = vmatprep.subr.bf16.mxu0 %v1089_v0  ;;  %761 = vmatprep.subr.bf16.mxu1 %v1089_v0  ;;  %v274_v3 = vld [vmem:[#allocation5 + $0x8] sm:$0xff]  ;;  %v360_v4 = vld [vmem:[#allocation7] sm:$0xff]  ;;  %v275_v7 = vld [vmem:[#allocation5 + $0x10] sm:$0xff]  ;;  %s264_s23 = scalar_lea.vmem [#allocation8], %s1307_s8  ;;  %s271_s27 = scalar_lea.vmem [#allocation9], %s1307_s8 }
  0x70   : > { %699 = vmatprep.mubr.msk.f32.mxu0 %vm1090_vm0, %v1091_v1  ;;  %734 = vmatprep.mubr.msk.f32.mxu1 %vm1090_vm0, %v1091_v1  ;;  %v738_v5 = vpack.c.bf16 %v274_v3, %v273_v2  ;;  %v361_v6 = vld [vmem:[#allocation7 + $0x8] sm:$0xff]  ;;  %v276_v8 = vld [vmem:[#allocation5 + $0x18] sm:$0xff]  ;;  %v362_v10 = vld [vmem:[#allocation7 + $0x10] sm:$0xff]  ;;  %s467_s25 = sshll.u32 %s264_s23, 4  ;;  %s481_s12 = sshll.u32 %s271_s27, 4  ;;  %s1340_s25 = int_to_ptr.vmem [resolvable:$true] %s467_s25  ;;  %s1342_s12 = int_to_ptr.vmem [resolvable:$true] %s481_s12 }
  0x71   : > { %v762_v9 = vpack.c.bf16 %v361_v6, %v360_v4  ;;  %v363_v11 = vld [vmem:[#allocation7 + $0x18] sm:$0xff]  ;;  %v741_v12 = vpack.c.bf16 %v276_v8, %v275_v7  ;;  %v277_v14 = vld [vmem:[#allocation5 + $0x20] sm:$0xff]  ;;  %v278_v15 = vld [vmem:[#allocation5 + $0x28] sm:$0xff]  ;;  %s629_s13 = sshll.u32 %s1074_s18, 7  ;;  %s448_s18 = scalar_lea.sflag [#allocation4], %s1304_s28 }
  0x72   : > { %739 = vmatpush3.bf16.msra.mxu0 %v738_v5  ;;  %v765_v13 = vpack.c.bf16 %v363_v11, %v362_v10  ;;  %v364_v16 = vld [vmem:[#allocation7 + $0x20] sm:$0xff]  ;;  %v365_v17 = vld [vmem:[#allocation7 + $0x28] sm:$0xff]  ;;  %v744_v18 = vpack.c.bf16 %v278_v15, %v277_v14  ;;  %v279_v20 = vld [vmem:[#allocation5 + $0x30] sm:$0xff]  ;;  %s1347_s10 = scalar_lea.hbm %s1424_s3, %s629_s13  ;;  %s1352_s24 = scalar_lea.hbm %s1425_s4, %s629_s13 }
  0x73   : > { %763 = vmatpush3.bf16.msra.mxu1 %v762_v9  ;;  %740 = vmatprep.subr.bf16.mxu0 %v1089_v0  ;;  %v768_v19 = vpack.c.bf16 %v365_v17, %v364_v16  ;;  %v280_v21 = vld [vmem:[#allocation5 + $0x38] sm:$0xff]  ;;  %v366_v22 = vld [vmem:[#allocation7 + $0x30] sm:$0xff]  ;;  %v281_v26 = vld [vmem:[#allocation5 + $0x40] sm:$0xff]  ;;  %s964_s7 = scalar_lea.vmem %s1340_s25, 128  ;;  %p1440_p12 = scmp.ne.s32.totalorder %s1436_s30, 0 }
  0x74   : > { %764 = vmatprep.subr.bf16.mxu1 %v1089_v0  ;;  %v367_v23 = vld [vmem:[#allocation7 + $0x38] sm:$0xff]  ;;  %v747_v24 = vpack.c.bf16 %v280_v21, %v279_v20  ;;  %v282_v27 = vld [vmem:[#allocation5 + $0x48] sm:$0xff]  ;;  %v368_v28 = vld [vmem:[#allocation7 + $0x40] sm:$0xff]  ;;  %p965_p8 = scmp.ne.s32.totalorder %s1340_s25, %s964_s7  ;;  %s1092_s8 = smov [#allocation8]  }
  0x75   : > { %v771_v25 = vpack.c.bf16 %v367_v23, %v366_v22  ;;  %v369_v29 = vld [vmem:[#allocation7 + $0x48] sm:$0xff]  ;;  %v750_v30 = vpack.c.bf16 %v282_v27, %v281_v26  ;;  %v283_v32 = vld [vmem:[#allocation5 + $0x50] sm:$0xff]  ;;  %v284_v33 = vld [vmem:[#allocation5 + $0x58] sm:$0xff]  ;;  %s968_s6 = sshll.u32 %s1092_s8, 4  ;;  %s969_s6 = int_to_ptr.vmem [resolvable:$false] %s968_s6 }
  0x76   : > { %742 = vmatpush3.bf16.msra.mxu0 %v741_v12  ;;  %v774_v31 = vpack.c.bf16 %v369_v29, %v368_v28  ;;  %v370_v34 = vld [vmem:[#allocation7 + $0x50] sm:$0xff]  ;;  %v371_v35 = vld [vmem:[#allocation7 + $0x58] sm:$0xff]  ;;  %v753_v36 = vpack.c.bf16 %v284_v33, %v283_v32  ;;  %v285_v38 = vld [vmem:[#allocation5 + $0x60] sm:$0xff]  ;;  %p966_p1 = pnand %p965_p8, %p1440_p12  ;;  %p971_p3 = scmp.lt.s32.totalorder %s1340_s25, %s969_s6 }
  0x77   : > { %766 = vmatpush3.bf16.msra.mxu1 %v765_v13  ;;  %743 = vmatprep.subr.bf16.mxu0 %v1089_v0  ;;  %v777_v37 = vpack.c.bf16 %v371_v35, %v370_v34  ;;  %v286_v39 = vld [vmem:[#allocation5 + $0x68] sm:$0xff]  ;;  %v372_v40 = vld [vmem:[#allocation7 + $0x60] sm:$0xff]  ;;  %v287_v44 = vld [vmem:[#allocation5 + $0x70] sm:$0xff] }
  0x78   : > { %767 = vmatprep.subr.bf16.mxu1 %v1089_v0  ;;  %v373_v41 = vld [vmem:[#allocation7 + $0x68] sm:$0xff]  ;;  %v756_v42 = vpack.c.bf16 %v286_v39, %v285_v38  ;;  %v288_v45 = vld [vmem:[#allocation5 + $0x78] sm:$0xff]  ;;  %v374_v46 = vld [vmem:[#allocation7 + $0x70] sm:$0xff]  ;;  %p967_p10 = pneg %p966_p1 }
  0x79   : > { %v780_v43 = vpack.c.bf16 %v373_v41, %v372_v40  ;;  %v375_v47 = vld [vmem:[#allocation7 + $0x78] sm:$0xff]  ;;  %v759_v48 = vpack.c.bf16 %v288_v45, %v287_v44 }
  0x7a   : > { %745 = vmatpush3.bf16.msra.mxu0 %v744_v18  ;;  %v783_v49 = vpack.c.bf16 %v375_v47, %v374_v46  ;;  %v272_v50 = vld [vmem:[%s234_s21] sm:$0xff]  ;;  %s970_s21 = scalar_lea.vmem %s969_s6, 256 }
  0x7b   : > { %769 = vmatpush3.bf16.msra.mxu1 %v768_v19  ;;  %746 = vmatprep.subr.bf16.mxu0 %v1089_v0  ;;  %p972_p5 = scmp.lt.s32.totalorder %s970_s21, %s964_s7 }
  0x7c   : > { %770 = vmatprep.subr.bf16.mxu1 %v1089_v0 }
  0x7d   : > { %p973_p9 = por %p972_p5, %p971_p3 }
  0x7e   : > { %748 = vmatpush3.bf16.msra.mxu0 %v747_v24 }
  0x7f   : > { %772 = vmatpush3.bf16.msra.mxu1 %v771_v25  ;;  %749 = vmatprep.subr.bf16.mxu0 %v1089_v0  ;;  %p974_p11 = pnand %p973_p9, %p967_p10 }
  0x80   : > { %773 = vmatprep.subr.bf16.mxu1 %v1089_v0 }
  0x82   : > { %751 = vmatpush3.bf16.msra.mxu0 %v750_v30 }
  0x83   : > { %775 = vmatpush3.bf16.msra.mxu1 %v774_v31  ;;  %752 = vmatprep.subr.bf16.mxu0 %v1089_v0 }
  0x84   : > { %776 = vmatprep.subr.bf16.mxu1 %v1089_v0 }
  0x86   : > { %754 = vmatpush3.bf16.msra.mxu0 %v753_v36 }
  0x87   : > { %778 = vmatpush3.bf16.msra.mxu1 %v777_v37  ;;  %755 = vmatprep.subr.bf16.mxu0 %v1089_v0 }
  0x88   : > { %779 = vmatprep.subr.bf16.mxu1 %v1089_v0 }
  0x8a   : > { %757 = vmatpush3.bf16.msra.mxu0 %v756_v42 }
  0x8b   : > { %781 = vmatpush3.bf16.msra.mxu1 %v780_v43  ;;  %758 = vmatprep.subr.bf16.mxu0 %v1089_v0 }
  0x8c   : > { %782 = vmatprep.subr.bf16.mxu1 %v1089_v0 }
  0x8e   : > { %760 = vmatpush3.bf16.msra.mxu0 %v759_v48 }
  0x8f   : > { %784 = vmatpush3.bf16.msra.mxu1 %v783_v49 }
  0x91   : > { %700 = vmatmul.mubr.f32.vlgmr.msra.gmra.mrb[0].mxu0 %v272_v50 }
  0x92   : > { %735 = vmatmul.mubr.f32.vlgmr.msra.gmra.mrb[0].mxu1 %v272_v50 }
 0x164   : > { %v355_v51 = vpop.f32.mrb[0].mxu0 }
 0x165   : > { %359 = vst [vmem:[%s264_s23] sm:$0xff] %v355_v51  ;;  %v442_v52 = vpop.f32.mrb[0].mxu1  ;;  %v701_v53 = vpop.f32.mrb[1].mxu0 }
 0x166   : > { %446 = vst [vmem:[%s271_s27] sm:$0xff] %v442_v52  ;;  %v736_v54 = vpop.f32.mrb[1].mxu1 }
 0x167   : > { %977 = shalt.err (!%p974_p11)
}
 0x168   : > { %s978_s23 = scalar_lea.hbm %s1347_s10, 128  ;;  %s982_s29 = scalar_lea.hbm %s1424_s3, 256 }
 0x169   : > { %p979_p0 = scmp.ne.s32.totalorder %s1347_s10, %s978_s23  ;;  %p983_p6 = scmp.lt.u32.totalorder %s1347_s10, %s1424_s3 }
 0x16a   : > { %p984_p7 = scmp.lt.u32.totalorder %s982_s29, %s978_s23  ;;  %p986_p8 = scmp.lt.u32.totalorder %s978_s23, %s1347_s10 }
 0x16b   : > { %p980_p4 = pnand %p979_p0, %p1440_p12 }
 0x16c   : > { %p985_p2 = por %p984_p7, %p983_p6 }
 0x16d   : > { %p981_p13 = pneg %p980_p4 }
 0x16e   : > { %p987_p1 = por %p986_p8, %p985_p2 }
 0x170   : > { %p988_p10 = pnand %p987_p1, %p981_p13 }
 0x172   : > { %991 = shalt.err (!%p988_p10)
}
 0x173   : > { %795 = dma.vmem_to_hbm [thread:$0]  (%p1440_p12), %s1340_s25, 128, %s1347_s10, %s448_s18  }
 0x174   : > { %s453_s11 = scalar_lea.sflag [#allocation10], %s1304_s28  ;;  %s992_s7 = scalar_lea.vmem %s1342_s12, 128 }
 0x175   : > { %p993_p3 = scmp.ne.s32.totalorder %s1342_s12, %s992_s7  ;;  %s1093_s8 = smov [#allocation9]  }
 0x176   : > { %s996_s6 = sshll.u32 %s1093_s8, 4  ;;  %s997_s6 = int_to_ptr.vmem [resolvable:$false] %s996_s6 }
 0x177   : > { %p994_p5 = pnand %p993_p3, %p1440_p12  ;;  %s998_s21 = scalar_lea.vmem %s997_s6, 256 }
 0x178   : > { %p999_p11 = scmp.lt.s32.totalorder %s1342_s12, %s997_s6  ;;  %p1000_p0 = scmp.lt.s32.totalorder %s998_s21, %s992_s7 }
 0x179   : > { %p995_p9 = pneg %p994_p5 }
 0x17a   : > { %p1001_p4 = por %p1000_p0, %p999_p11 }
 0x17c   : > { %p1002_p13 = pnand %p1001_p4, %p995_p9 }
 0x17e   : > { %1005 = shalt.err (!%p1002_p13)
}
 0x17f   : > { %s1006_s28 = scalar_lea.hbm %s1352_s24, 128  ;;  %s1010_s18 = scalar_lea.hbm %s1425_s4, 256 }
 0x180   : > { %p1007_p6 = scmp.ne.s32.totalorder %s1352_s24, %s1006_s28  ;;  %p1011_p8 = scmp.lt.u32.totalorder %s1352_s24, %s1425_s4 }
 0x181   : > { %p1012_p1 = scmp.lt.u32.totalorder %s1010_s18, %s1006_s28  ;;  %p1014_p3 = scmp.lt.u32.totalorder %s1006_s28, %s1352_s24 }
 0x182   : > { %p1008_p7 = pnand %p1007_p6, %p1440_p12 }
 0x183   : > { %p1013_p10 = por %p1012_p1, %p1011_p8 }
 0x184   : > { %p1009_p2 = pneg %p1008_p7 }
 0x185   : > { %p1015_p5 = por %p1014_p3, %p1013_p10 }
 0x187   : > { %p1016_p9 = pnand %p1015_p5, %p1009_p2 }
 0x189   : > { %1019 = shalt.err (!%p1016_p9)
}
 0x18a   : > { %796 = dma.vmem_to_hbm [thread:$0]  (%p1440_p12), %s1342_s12, 128, %s1352_s24, %s453_s11  }
 0x18b PF: > { %s493_s13 = sand.u32 1, %s1062_s15   ;;  %p1441_p11 = scmp.ne.s32.totalorder %s1433_s26, 0 }
 0x18c   : > { %p1442_p0 = scmp.ge.s32.totalorder %s1082_s20, 2  ;;  %s494_s29 = scalar_lea.sflag [#allocation4], %s493_s13 }
 0x18e   : > { %p811_p4 = pnand %p1442_p0, %p1441_p11 }
 0x190   : > { %1053 = dma.done.wait (!%p811_p4), %s494_s29, 128  }
 0x191   : > { %1055 = vsyncadd (!%p811_p4), %s494_s29, 4294967168  ;;  %s503_s14 = scalar_lea.sflag [#allocation10], %s493_s13 }
 0x192   : > { %1057 = dma.done.wait (!%p811_p4), %s503_s14, 128  }
 0x193   : > { %1059 = vsyncadd (!%p811_p4), %s503_s14, 4294967168  ;;  %s25_s20 = sadd.s32 1, %s1082_s20   ;;  %s1443_s15 = smov %s1066_s16 }
 0x194   : > { %p22_p13 = scmp.ge.s32.totalorder %s25_s20, 4   ;;  %s1444_s16 = smov %s1070_s17 }
 0x195   : > { %s1445_s17 = smov %s1261_s22  ;;  %s1446_s18 = smov %s1078_s19 }
 0x196   : > { %s1447_s19 = smov %s1449_s5  ;;  %24 = sbr.rel (!%p22_p13) target bundleno = 9 (0x9), region = 102 }
 0x19d   :  { %508 = vsyncpa [#allocation3], 1 }
 0x19e   :  { %510 = vsyncpa [#allocation3 + $0x1], 1 }
 0x19f   :  { %511 = vsyncpa [#allocation6], 1 }
 0x1a0   :  { %512 = vsyncpa [#allocation4], 1 }
 0x1a1   :  { %514 = vsyncpa [#allocation4 + $0x1], 1 }
 0x1a2   :  { %515 = vsyncpa [#allocation10], 1 }
 0x1a3   :  { %517 = vsyncpa [#allocation10 + $0x1], 1 }

</bundles_post_ra>
